<compile_context>
chip_gen: v6e
topology: v6e:2x2x1
jax: 0.10.0
libtpu: 0.0.40
codegen_flags: <defaults>
</compile_context>

<pallas_src>
import functools

import jax
import jax.numpy as jnp
from jax.experimental import pallas as pl
from jax.experimental.pallas import tpu as pltpu

_LANES = 128
_SUBLANE = 8
_HIDDEN = 128          # fixed by the PyTorch module (nn.Linear(vocab_size, 128))
_NEG_INF = -1e30


def _round_up(n, m):
    return (n + m - 1) // m * m


# --------------------------------------------------------------------------- #
# Kernel
# --------------------------------------------------------------------------- #
def _classifier_kernel(x_ref, w1_ref, b1_ref, w2_ref, b2_ref, out_ref, acc_ref,
                       *, tv, compute_dtype):
    """Grid: (batch tiles, vocab tiles). Vocab is the reduction axis (last)."""
    k = pl.program_id(1)

    @pl.when(k == 0)
    def _init():
        acc_ref[...] = jnp.zeros_like(acc_ref)

    # W1 is fully resident in VMEM; slice the current vocab chunk out of it.
    # Offsets are multiples of 128, so the slice never crosses (8,128) tiles.
    off = pl.multiple_of(k * tv, _LANES)
    w1_tile = w1_ref[pl.ds(off, tv), :]

    # Cast x per-tile in-kernel (VPU) instead of a wrapper-side HBM round-trip.
    x_tile = x_ref[...].astype(compute_dtype)

    acc_ref[...] += jnp.dot(x_tile, w1_tile, preferred_element_type=jnp.float32)

    @pl.when(k == pl.num_programs(1) - 1)
    def _epilogue():
        # Bias + ReLU (clamp(min=0)) in f32.
        hidden = jnp.maximum(acc_ref[...] + b1_ref[...], 0.0)
        # Second layer on lane-padded weights; single-pass MXU in compute_dtype.
        logits = (
            jnp.dot(hidden.astype(compute_dtype), w2_ref[...],
                    preferred_element_type=jnp.float32)
            + b2_ref[...]
        )
        # log_softmax over the 128-lane padded axis: padded logits are ~-1e30
        # so their exp() is exactly 0 and the normalizer matches the unpadded one.
        m = jnp.max(logits, axis=-1, keepdims=True)
        shifted = logits - m
        lse = jnp.log(jnp.sum(jnp.exp(shifted), axis=-1, keepdims=True))
        out_ref[...] = (shifted - lse).astype(out_ref.dtype)


# --------------------------------------------------------------------------- #
# Tiling / parameter preparation (one-time, outside the per-call path)
# --------------------------------------------------------------------------- #
def _select_tiles(batch_hint, V, H, Lp, x_itemsize, w_itemsize,
                  tb_max=256, tv_max=8192, vmem_budget=48 * 1024 * 1024):
    """Pick batch tile TB, vocab tile TV, and padded vocab Vp."""
    TB = min(_round_up(max(batch_hint, 1), _SUBLANE), tb_max)
    if batch_hint >= 256:
        # Ensure >= 2 batch tiles so both v7x TensorCores get work.
        TB = min(TB, _round_up(batch_hint // 2, _SUBLANE))

    TV = min(_round_up(V, _LANES), _round_up(tv_max, _LANES))

    def vmem_est(tv):
        vp = _round_up(V, tv)
        return (2 * TB * tv * x_itemsize                        # x tiles (2x buffered)
                + 2 * vp * H * w_itemsize                       # resident W1 (conservative)
                + 2 * TB * Lp * 4                               # output block
                + 2 * (H * 4 + H * Lp * w_itemsize + Lp * 4)    # b1 / W2 / b2
                + TB * H * 4)                                   # f32 accumulator

    while TV > 512 and vmem_est(TV) > vmem_budget:
        TV = _round_up(TV // 2, _LANES)

    return TB, TV, _round_up(V, TV)


def prepare_params(w1, b1, w2, b2, *, compute_dtype=jnp.bfloat16, batch_hint=256):
    """Pad + cast the weights once.  w1: (V, H); b1: (H,); w2: (H, L); b2: (L,)."""
    V, H = w1.shape
    L = w2.shape[1]
    assert H == _HIDDEN, "module fixes the hidden width at 128"

    Lp = max(_LANES, _round_up(L, _LANES))
    TB, TV, Vp = _select_tiles(
        batch_hint, V, H, Lp,
        x_itemsize=4,
        w_itemsize=jnp.dtype(compute_dtype).itemsize,
    )

    # First-layer weight: padded along vocab (zeros => no contribution), pre-cast.
    w1p = jnp.zeros((Vp, H), compute_dtype).at[:V, :].set(w1.astype(compute_dtype))
    b1p = b1.reshape(1, H).astype(jnp.float32)
    # Second-layer weight/bias padded to 128 lanes; padded bias = -1e30.
    w2p = jnp.zeros((H, Lp), compute_dtype).at[:, :L].set(w2.astype(compute_dtype))
    b2p = (jnp.full((1, Lp), _NEG_INF, jnp.float32)
           .at[0, :L].set(b2.astype(jnp.float32)))

    return dict(w1=w1p, b1=b1p, w2=w2p, b2=b2p,
                V=V, L=L, Lp=Lp, TV=TV, tb_max=TB, compute_dtype=compute_dtype)


# --------------------------------------------------------------------------- #
# Forward
# --------------------------------------------------------------------------- #
@functools.partial(
    jax.jit, static_argnames=("V", "L", "Lp", "TV", "tb_max", "compute_dtype")
)
def _forward(x, w1p, b1p, w2p, b2p, *, V, L, Lp, TV, tb_max, compute_dtype):
    B = x.shape[0]
    assert x.shape[1] == V
    Vp, H = w1p.shape

    TB = min(_round_up(B, _SUBLANE), tb_max)
    Bp = _round_up(B, TB)

    # Pad x (zeros) only when needed; no dtype cast here (cast happens in-kernel).
    xp = x
    if (Bp, Vp) != (B, V):
        xp = jnp.zeros((Bp, Vp), x.dtype).at[:B, :V].set(x)

    grid = (Bp // TB, Vp // TV)

    x_itemsize = jnp.dtype(xp.dtype).itemsize
    w_itemsize = jnp.dtype(compute_dtype).itemsize
    vmem_est = (2 * TB * TV * x_itemsize
                + 2 * Vp * H * w_itemsize
                + 2 * TB * Lp * 4
                + 2 * (H * 4 + H * Lp * w_itemsize + Lp * 4)
                + TB * H * 4)
    # Leave headroom below v7x's 64 MiB physical VMEM.
    vmem_limit = int(min(max(vmem_est + (8 << 20), 32 << 20), 56 << 20))

    cost = pl.CostEstimate(
        flops=2 * Bp * Vp * H + 2 * Bp * H * Lp,
        transcendentals=Bp * Lp,
        bytes_accessed=(xp.size * x_itemsize
                        + (w1p.size + w2p.size) * w_itemsize
                        + (b1p.size + b2p.size) * 4
                        + Bp * Lp * 4),
    )

    kernel = functools.partial(_classifier_kernel, tv=TV, compute_dtype=compute_dtype)

    out_padded = pl.pallas_call(
        kernel,
        out_shape=jax.ShapeDtypeStruct((Bp, Lp), jnp.float32),
        grid_spec=pltpu.PrefetchScalarGridSpec(
            num_scalar_prefetch=0,
            grid=grid,
            in_specs=[
                pl.BlockSpec((TB, TV), lambda i, k: (i, k)),   # x tile (streamed)
                pl.BlockSpec((Vp, H), lambda i, k: (0, 0)),    # W1 (fully resident)
                pl.BlockSpec((1, H), lambda i, k: (0, 0)),     # b1 (resident)
                pl.BlockSpec((H, Lp), lambda i, k: (0, 0)),    # W2 (resident)
                pl.BlockSpec((1, Lp), lambda i, k: (0, 0)),    # b2 (resident)
            ],
            out_specs=pl.BlockSpec((TB, Lp), lambda i, k: (i, 0)),
            scratch_shapes=[pltpu.VMEM((TB, H), jnp.float32)],
        ),
        compiler_params=pltpu.CompilerParams(
            dimension_semantics=("parallel", "arbitrary"),
            vmem_limit_bytes=vmem_limit,
        ),
        cost_estimate=cost,
    )(xp, w1p, b1p, w2p, b2p)

    # Drop padded batch rows / label columns.
    return out_padded[:B, :L]


def simple_text_classifier(x, params):
    return _forward(
        x, params["w1"], params["b1"], params["w2"], params["b2"],
        V=params["V"], L=params["L"], Lp=params["Lp"], TV=params["TV"],
        tb_max=params["tb_max"], compute_dtype=params["compute_dtype"],
    )


# --------------------------------------------------------------------------- #
# Pure-JAX reference
# --------------------------------------------------------------------------- #
def reference(x, w1, b1, w2, b2, compute_dtype=jnp.float32):
    h = jnp.dot(x.astype(compute_dtype), w1.astype(compute_dtype),
                preferred_element_type=jnp.float32)
    h = jnp.maximum(h + b1, 0.0)
    logits = jnp.dot(h.astype(compute_dtype), w2.astype(compute_dtype),
                     preferred_element_type=jnp.float32) + b2
    return jax.nn.log_softmax(logits, axis=1)


if __name__ == "__main__":
    # Small, TPU-friendly shapes implied by the module.
    batch = 8
    vocab_size = 256
    hidden_dim = _HIDDEN
    num_labels = 4

    key = jax.random.PRNGKey(0)
    kx, kw1, kb1, kw2, kb2 = jax.random.split(key, 5)

    # Deterministic init mimicking nn.Linear's U(-1/sqrt(fan_in), 1/sqrt(fan_in)).
    x = jax.random.uniform(kx, (batch, vocab_size), jnp.float32)  # bag-of-words features
    bound1 = 1.0 / (vocab_size ** 0.5)
    w1 = jax.random.uniform(kw1, (vocab_size, hidden_dim), jnp.float32, -bound1, bound1)
    b1 = jax.random.uniform(kb1, (hidden_dim,), jnp.float32, -bound1, bound1)
    bound2 = 1.0 / (hidden_dim ** 0.5)
    w2 = jax.random.uniform(kw2, (hidden_dim, num_labels), jnp.float32, -bound2, bound2)
    b2 = jax.random.uniform(kb2, (num_labels,), jnp.float32, -bound2, bound2)

    # ---- f32 path: bit-tight check against the f32 JAX reference ----
    params_f32 = prepare_params(w1, b1, w2, b2,
                                compute_dtype=jnp.float32, batch_hint=batch)
    out_f32 = jax.block_until_ready(simple_text_classifier(x, params_f32))
    ref_f32 = reference(x, w1, b1, w2, b2, jnp.float32)
    assert out_f32.shape == (batch, num_labels)
    assert jnp.allclose(out_f32, ref_f32, atol=1e-5, rtol=1e-5), "f32 mismatch"

    # ---- default bf16-traffic path: compare against a bf16 reference (tight)
    #      and the f32 reference (loose drift bound) ----
    params_bf16 = prepare_params(w1, b1, w2, b2,
                                 compute_dtype=jnp.bfloat16, batch_hint=batch)
    out_bf16 = jax.block_until_ready(simple_text_classifier(x, params_bf16))
    ref_bf16 = reference(x, w1, b1, w2, b2, jnp.bfloat16)
    assert out_bf16.shape == (batch, num_labels)
    assert jnp.allclose(out_bf16, ref_bf16, atol=5e-2, rtol=5e-2), "bf16 mismatch"
    assert jnp.allclose(out_bf16, ref_f32, atol=1e-1, rtol=1e-1), "bf16 vs f32 drift"

    print("KERNEL_OK")
</pallas_src>

<mosaic_0001>
module attributes {stable_mosaic.version = 11 : i64} {
  func.func @_classifier_kernel(%arg0: i32, %arg1: i32, %arg2: memref<8x256xf32, #tpu.memory_space<vmem>>, %arg3: memref<256x128xf32, #tpu.memory_space<vmem>>, %arg4: memref<1x128xf32, #tpu.memory_space<vmem>>, %arg5: memref<128x128xf32, #tpu.memory_space<vmem>>, %arg6: memref<1x128xf32, #tpu.memory_space<vmem>>, %arg7: memref<8x128xf32, #tpu.memory_space<vmem>>, %arg8: memref<8x128xf32, #tpu.memory_space<vmem>>) attributes {dimension_semantics = [#tpu.dimension_semantics<parallel>, #tpu.dimension_semantics<arbitrary>], iteration_bounds = array<i64: 1, 1>, scalar_prefetch = 0 : i64, scratch_operands = 1 : i64, tpu.core_type = #tpu.core_type<tc>, window_params = [{transform_indices = @transform_0, window_bounds = array<i64: 8, 256>}, {pipeline_mode = #tpu.pipeline_mode<synchronous>, transform_indices = @transform_1, window_bounds = array<i64: 256, 128>}, {pipeline_mode = #tpu.pipeline_mode<synchronous>, transform_indices = @transform_2, window_bounds = array<i64: 1, 128>}, {pipeline_mode = #tpu.pipeline_mode<synchronous>, transform_indices = @transform_3, window_bounds = array<i64: 128, 128>}, {pipeline_mode = #tpu.pipeline_mode<synchronous>, transform_indices = @transform_4, window_bounds = array<i64: 1, 128>}, {transform_indices = @transform_5, window_bounds = array<i64: 8, 128>}]} {
    %c0_i32 = arith.constant 0 : i32
    %0 = arith.cmpi eq, %arg1, %c0_i32 : i32
    %1 = arith.extui %0 : i1 to i32
    %c0_i32_0 = arith.constant 0 : i32
    %2 = arith.cmpi ne, %1, %c0_i32_0 : i32
    scf.if %2 {
      %cst_9 = arith.constant 0.000000e+00 : f32
      %15 = vector.broadcast %cst_9 : f32 to vector<8x128xf32>
      %c0_10 = arith.constant 0 : index
      %c0_11 = arith.constant 0 : index
      %16 = vector.load %arg8[%c0_10, %c0_11] : memref<8x128xf32, #tpu.memory_space<vmem>>, vector<8x128xf32>
      tpu.vector_store %arg8[%c0_10, %c0_11], %15 {strides = array<i32>} : memref<8x128xf32, #tpu.memory_space<vmem>>, vector<8x128xf32>,
    } else {
    }
    %c256_i32 = arith.constant 256 : i32
    %3 = arith.muli %arg1, %c256_i32 : i32
    %4 = tpu.assume_multiple %3, 128 : i32
    %5 = arith.index_cast %4 : i32 to index
    %c0 = arith.constant 0 : index
    %6 = vector.load %arg3[%5, %c0] : memref<256x128xf32, #tpu.memory_space<vmem>>, vector<256x128xf32>
    %c0_1 = arith.constant 0 : index
    %c0_2 = arith.constant 0 : index
    %7 = vector.load %arg2[%c0_1, %c0_2] : memref<8x256xf32, #tpu.memory_space<vmem>>, vector<8x256xf32>
    %c0_3 = arith.constant 0 : index
    %c0_4 = arith.constant 0 : index
    %8 = vector.load %arg8[%c0_3, %c0_4] : memref<8x128xf32, #tpu.memory_space<vmem>>, vector<8x128xf32>
    %cst = arith.constant dense<0.000000e+00> : vector<8x128xf32>
    %9 = tpu.matmul %7, %6, %cst {dimension_numbers = #tpu.dot_dimension_numbers<[1], [0], [0], [1], [0, 0, 1, 1], [], []>} : vector<8x256xf32>, vector<256x128xf32>, vector<8x128xf32> -> vector<8x128xf32>
    %10 = arith.addf %8, %9 : vector<8x128xf32>
    %c0_5 = arith.constant 0 : index
    %c0_6 = arith.constant 0 : index
    %11 = vector.load %arg8[%c0_5, %c0_6] : memref<8x128xf32, #tpu.memory_space<vmem>>, vector<8x128xf32>
    tpu.vector_store %arg8[%c0_5, %c0_6], %10 {strides = array<i32>} : memref<8x128xf32, #tpu.memory_space<vmem>>, vector<8x128xf32>,
    %c0_i32_7 = arith.constant 0 : i32
    %12 = arith.cmpi eq, %arg1, %c0_i32_7 : i32
    %13 = arith.extui %12 : i1 to i32
    %c0_i32_8 = arith.constant 0 : i32
    %14 = arith.cmpi ne, %13, %c0_i32_8 : i32
    scf.if %14 {
      %c0_9 = arith.constant 0 : index
      %c0_10 = arith.constant 0 : index
      %15 = vector.load %arg8[%c0_9, %c0_10] : memref<8x128xf32, #tpu.memory_space<vmem>>, vector<8x128xf32>
      %c0_11 = arith.constant 0 : index
      %c0_12 = arith.constant 0 : index
      %16 = vector.load %arg4[%c0_11, %c0_12] : memref<1x128xf32, #tpu.memory_space<vmem>>, vector<1x128xf32>
      %17 = vector.broadcast %16 : vector<1x128xf32> to vector<8x128xf32>
      %18 = arith.addf %15, %17 : vector<8x128xf32>
      %cst_13 = arith.constant 0.000000e+00 : f32
      %19 = vector.broadcast %cst_13 : f32 to vector<8x128xf32>
      %20 = arith.maximumf %18, %19 : vector<8x128xf32>
      %c0_14 = arith.constant 0 : index
      %c0_15 = arith.constant 0 : index
      %21 = vector.load %arg5[%c0_14, %c0_15] : memref<128x128xf32, #tpu.memory_space<vmem>>, vector<128x128xf32>
      %cst_16 = arith.constant dense<0.000000e+00> : vector<8x128xf32>
      %22 = tpu.matmul %20, %21, %cst_16 {dimension_numbers = #tpu.dot_dimension_numbers<[1], [0], [0], [1], [0, 0, 1, 1], [], []>} : vector<8x128xf32>, vector<128x128xf32>, vector<8x128xf32> -> vector<8x128xf32>
      %c0_17 = arith.constant 0 : index
      %c0_18 = arith.constant 0 : index
      %23 = vector.load %arg6[%c0_17, %c0_18] : memref<1x128xf32, #tpu.memory_space<vmem>>, vector<1x128xf32>
      %24 = vector.broadcast %23 : vector<1x128xf32> to vector<8x128xf32>
      %25 = arith.addf %22, %24 : vector<8x128xf32>
      %cst_19 = arith.constant dense<0xFF800000> : vector<8xf32>
      %26 = vector.multi_reduction <maximumf>, %25, %cst_19 [1] : vector<8x128xf32> to vector<8xf32>
      %27 = vector.shape_cast %26 : vector<8xf32> to vector<8x1xf32>
      %28 = vector.broadcast %27 : vector<8x1xf32> to vector<8x128xf32>
      %29 = arith.subf %25, %28 : vector<8x128xf32>
      %30 = math.exp %29 : vector<8x128xf32>
      %cst_20 = arith.constant dense<0.000000e+00> : vector<8xf32>
      %31 = vector.multi_reduction <add>, %30, %cst_20 [1] : vector<8x128xf32> to vector<8xf32>
      %32 = vector.shape_cast %31 : vector<8xf32> to vector<8x1xf32>
      %33 = math.log %32 : vector<8x1xf32>
      %34 = vector.broadcast %33 : vector<8x1xf32> to vector<8x128xf32>
      %35 = arith.subf %29, %34 : vector<8x128xf32>
      %c0_21 = arith.constant 0 : index
      %c0_22 = arith.constant 0 : index
      %36 = vector.load %arg7[%c0_21, %c0_22] : memref<8x128xf32, #tpu.memory_space<vmem>>, vector<8x128xf32>
      tpu.vector_store %arg7[%c0_21, %c0_22], %35 {strides = array<i32>} : memref<8x128xf32, #tpu.memory_space<vmem>>, vector<8x128xf32>,
    } else {
    }
    return
  }
  func.func @transform_0(%arg0: i32, %arg1: i32) -> (i32, i32) {
    %c0_i32 = arith.constant 0 : i32
    return %arg0, %arg1 : i32, i32
  }
  func.func @transform_1(%arg0: i32, %arg1: i32) -> (i32, i32) {
    %c0_i32 = arith.constant 0 : i32
    %c0_i32_0 = arith.constant 0 : i32
    %c0_i32_1 = arith.constant 0 : i32
    return %c0_i32, %c0_i32_0 : i32, i32
  }
  func.func @transform_2(%arg0: i32, %arg1: i32) -> (i32, i32) {
    %c0_i32 = arith.constant 0 : i32
    %c0_i32_0 = arith.constant 0 : i32
    %c0_i32_1 = arith.constant 0 : i32
    return %c0_i32, %c0_i32_0 : i32, i32
  }
  func.func @transform_3(%arg0: i32, %arg1: i32) -> (i32, i32) {
    %c0_i32 = arith.constant 0 : i32
    %c0_i32_0 = arith.constant 0 : i32
    %c0_i32_1 = arith.constant 0 : i32
    return %c0_i32, %c0_i32_0 : i32, i32
  }
  func.func @transform_4(%arg0: i32, %arg1: i32) -> (i32, i32) {
    %c0_i32 = arith.constant 0 : i32
    %c0_i32_0 = arith.constant 0 : i32
    %c0_i32_1 = arith.constant 0 : i32
    return %c0_i32, %c0_i32_0 : i32, i32
  }
  func.func @transform_5(%arg0: i32, %arg1: i32) -> (i32, i32) {
    %c0_i32 = arith.constant 0 : i32
    %c0_i32_0 = arith.constant 0 : i32
    return %arg0, %c0_i32 : i32, i32
  }
}

</mosaic_0001>

<bundles_post_ra>
// kernel: _forward.1
= control target key start
LH: loop header
LB: loop body
LE: loop exit
PB: predicated region body
PF: predicated region fallthrough
CT: control target
= control target key end

     0   :  { %10 = vsyncpa [#allocation4], 0  ;;  %s532_s0 = inlined_call_operand.hbm [shape: f32[8,256], index: 0, kind: input, shape index: {}]   ;;  %s533_s1 = inlined_call_operand.hbm [shape: f32[256,128], index: 1, kind: input, shape index: {}]   ;;  %s534_s2 = inlined_call_operand.vmem [shape: f32[1,128], index: 2, kind: input, shape index: {}]   ;;  %s535_s3 = inlined_call_operand.hbm [shape: f32[128,128], index: 3, kind: input, shape index: {}]   ;;  %s536_s4 = inlined_call_operand.vmem [shape: f32[1,128], index: 4, kind: input, shape index: {}]   ;;  %s537_s5 = inlined_call_operand.vmem [shape: f32[8,128], index: 5, kind: output, shape index: {}]  }
   0x1   :  { %11 = vsyncpa [#allocation6], 0  ;;  %s460_s18 = smov [#allocation5]  }
   0x2   :  { %s27_s19 = sshll.u32 %s460_s18, 4  ;;  %s28_s19 = int_to_ptr.vmem [resolvable:$true] %s27_s19 }
   0x3   :  { %s404_s20 = scalar_lea.vmem %s28_s19, 4096  ;;  %p409_p1 = scmp.lt.s32.totalorder %s28_s19, %s28_s19 }
   0x4   :  { %p405_p0 = scmp.ne.s32.totalorder %s28_s19, %s404_s20  ;;  %p410_p2 = scmp.lt.s32.totalorder %s404_s20, %s404_s20 }
   0x6   :  { %p411_p3 = por %p410_p2, %p409_p1 }
   0x8   :  { %p412_p4 = pnand %p411_p3, %p405_p0 }
   0xa   :  { %415 = shalt.err (!%p412_p4)
}
   0xb   :  { %s461_s21 = smov 128   ;;  %s462_s22 = smov 8  }
   0xc   :  { %33 = dma.hbm_to_vmem [thread:$0]  %s533_s1, 4096, %s28_s19, [#allocation6], %s461_s21, %s461_s21, %s462_s22  }
   0xd   :  { %s463_s25 = smov [#allocation3]   ;;  %s464_s27 = smov [#allocation7]  }
   0xe   :  { %s18_s26 = sshll.u32 %s463_s25, 4  ;;  %s41_s28 = sshll.u32 %s464_s27, 4  ;;  %s19_s26 = int_to_ptr.vmem [resolvable:$true] %s18_s26  ;;  %s42_s28 = int_to_ptr.vmem [resolvable:$true] %s41_s28 }
   0xf   :  { %s424_s29 = scalar_lea.vmem %s19_s26, 256  ;;  %p429_p6 = scmp.lt.s32.totalorder %s19_s26, %s19_s26 }
  0x10   :  { %p425_p5 = scmp.ne.s32.totalorder %s19_s26, %s424_s29  ;;  %p430_p7 = scmp.lt.s32.totalorder %s424_s29, %s424_s29 }
  0x12   :  { %p431_p8 = por %p430_p7, %p429_p6 }
  0x14   :  { %p432_p9 = pnand %p431_p8, %p425_p5 }
  0x16   :  { %435 = shalt.err (!%p432_p9)
}
  0x17   :  { %21 = dma.hbm_to_vmem [thread:$0]  %s532_s0, 256, %s19_s26, [#allocation4]  }
  0x18   :  { %s444_s7 = scalar_lea.vmem %s42_s28, 2048  ;;  %p449_p11 = scmp.lt.s32.totalorder %s42_s28, %s42_s28 }
  0x19   :  { %p445_p10 = scmp.ne.s32.totalorder %s42_s28, %s444_s7  ;;  %p450_p12 = scmp.lt.s32.totalorder %s444_s7, %s444_s7 }
  0x1b   :  { %p451_p13 = por %p450_p12, %p449_p11 }
  0x1d   :  { %p452_p0 = pnand %p451_p13, %p445_p10 }
  0x1f   :  { %455 = shalt.err (!%p452_p0)
}
  0x20   :  { %47 = dma.hbm_to_vmem [thread:$0]  %s535_s3, 2048, %s42_s28, [#allocation6], %s461_s21, %s461_s21, %s462_s22  }
  0x21   :  { %456 = dma.done.wait [#allocation4], 256  }
  0x22   :  { %457 = vsyncadd [#allocation4], 4294967040 }
  0x23   :  { %458 = dma.done.wait [#allocation6], 6144  }
  0x24   :  { %459 = vsyncadd [#allocation6], 4294961152  ;;  %v465_v0 = vmov 0.0   ;;  %v97_v1 = vld [vmem:[#allocation5 + $0xf8] sm:$0xff]  ;;  %v96_v3 = vld [vmem:[#allocation5 + $0xf0] sm:$0xff]  ;;  %vm466_vm0 = vmmov 0  }
  0x25   :  { %350 = vmatprep.subr.mxu1 %v465_v0  ;;  %v81_v2 = vld [vmem:[#allocation5 + $0x78] sm:$0xff]  ;;  %298 = vmatprep.subr.mxu0 %v97_v1  ;;  %v80_v4 = vld [vmem:[#allocation5 + $0x70] sm:$0xff]  ;;  %v95_v5 = vld [vmem:[#allocation5 + $0xe8] sm:$0xff] }
  0x26   :  { %299 = vmatpush3.msra.mxu0 %v81_v2  ;;  %v79_v6 = vld [vmem:[#allocation5 + $0x68] sm:$0xff]  ;;  %v94_v7 = vld [vmem:[#allocation5 + $0xe0] sm:$0xff]  ;;  %v93_v9 = vld [vmem:[#allocation5 + $0xd8] sm:$0xff]  ;;  %382 = vmatprep.mubr.msk.f32.mxu1 %vm466_vm0, %v465_v0 }
  0x27   :  { %300 = vmatprep.subr.mxu0 %v96_v3  ;;  %v78_v8 = vld [vmem:[#allocation5 + $0x60] sm:$0xff]  ;;  %v77_v10 = vld [vmem:[#allocation5 + $0x58] sm:$0xff]  ;;  %v92_v11 = vld [vmem:[#allocation5 + $0xd0] sm:$0xff] }
  0x28   :  { %301 = vmatpush3.msra.mxu0 %v80_v4  ;;  %v76_v12 = vld [vmem:[#allocation5 + $0x50] sm:$0xff]  ;;  %v91_v13 = vld [vmem:[#allocation5 + $0xc8] sm:$0xff]  ;;  %v99_v14 = vld [vmem:[#allocation3 + $0x8] sm:$0xff] }
  0x29   :  { %302 = vmatprep.subr.mxu0 %v95_v5  ;;  %v75_v15 = vld [vmem:[#allocation5 + $0x48] sm:$0xff]  ;;  %165 = vmatprep.mubr.f32.mxu0 %v99_v14  ;;  %v201_v16 = vld [vmem:[#allocation7 + $0x78] sm:$0xff]  ;;  %v200_v17 = vld [vmem:[#allocation7 + $0x70] sm:$0xff] }
  0x2a   :  { %303 = vmatpush3.msra.mxu0 %v79_v6  ;;  %v90_v18 = vld [vmem:[#allocation5 + $0xc0] sm:$0xff]  ;;  %351 = vmatpush3.msra.mxu1 %v201_v16  ;;  %v199_v20 = vld [vmem:[#allocation7 + $0x68] sm:$0xff]  ;;  %v89_v21 = vld [vmem:[#allocation5 + $0xb8] sm:$0xff] }
  0x2b   :  { %304 = vmatprep.subr.mxu0 %v94_v7  ;;  %v74_v19 = vld [vmem:[#allocation5 + $0x40] sm:$0xff]  ;;  %352 = vmatprep.subr.mxu1 %v465_v0  ;;  %v73_v22 = vld [vmem:[#allocation5 + $0x38] sm:$0xff]  ;;  %v88_v24 = vld [vmem:[#allocation5 + $0xb0] sm:$0xff] }
  0x2c   :  { %305 = vmatpush3.msra.mxu0 %v78_v8  ;;  %353 = vmatpush3.msra.mxu1 %v200_v17  ;;  %v198_v23 = vld [vmem:[#allocation7 + $0x60] sm:$0xff]  ;;  %v72_v25 = vld [vmem:[#allocation5 + $0x30] sm:$0xff]  ;;  %v197_v26 = vld [vmem:[#allocation7 + $0x58] sm:$0xff] }
  0x2d   :  { %306 = vmatprep.subr.mxu0 %v93_v9  ;;  %354 = vmatprep.subr.mxu1 %v465_v0  ;;  %v87_v27 = vld [vmem:[#allocation5 + $0xa8] sm:$0xff]  ;;  %v196_v29 = vld [vmem:[#allocation7 + $0x50] sm:$0xff]  ;;  %v86_v30 = vld [vmem:[#allocation5 + $0xa0] sm:$0xff] }
  0x2e   :  { %307 = vmatpush3.msra.mxu0 %v77_v10  ;;  %355 = vmatpush3.msra.mxu1 %v199_v20  ;;  %v71_v28 = vld [vmem:[#allocation5 + $0x28] sm:$0xff]  ;;  %v70_v31 = vld [vmem:[#allocation5 + $0x20] sm:$0xff]  ;;  %v85_v33 = vld [vmem:[#allocation5 + $0x98] sm:$0xff] }
  0x2f   :  { %308 = vmatprep.subr.mxu0 %v92_v11  ;;  %356 = vmatprep.subr.mxu1 %v465_v0  ;;  %v195_v32 = vld [vmem:[#allocation7 + $0x48] sm:$0xff]  ;;  %v69_v34 = vld [vmem:[#allocation5 + $0x18] sm:$0xff]  ;;  %v194_v35 = vld [vmem:[#allocation7 + $0x40] sm:$0xff] }
  0x30   :  { %309 = vmatpush3.msra.mxu0 %v76_v12  ;;  %357 = vmatpush3.msra.mxu1 %v198_v23  ;;  %v84_v36 = vld [vmem:[#allocation5 + $0x90] sm:$0xff]  ;;  %v193_v38 = vld [vmem:[#allocation7 + $0x38] sm:$0xff]  ;;  %v83_v39 = vld [vmem:[#allocation5 + $0x88] sm:$0xff] }
  0x31   :  { %310 = vmatprep.subr.mxu0 %v91_v13  ;;  %358 = vmatprep.subr.mxu1 %v465_v0  ;;  %v68_v37 = vld [vmem:[#allocation5 + $0x10] sm:$0xff]  ;;  %v67_v40 = vld [vmem:[#allocation5 + $0x8] sm:$0xff]  ;;  %v82_v42 = vld [vmem:[#allocation5 + $0x80] sm:$0xff] }
  0x32   :  { %311 = vmatpush3.msra.mxu0 %v75_v15  ;;  %359 = vmatpush3.msra.mxu1 %v197_v26  ;;  %v192_v41 = vld [vmem:[#allocation7 + $0x30] sm:$0xff]  ;;  %v66_v43 = vld [vmem:[#allocation5] sm:$0xff]  ;;  %v191_v44 = vld [vmem:[#allocation7 + $0x28] sm:$0xff] }
  0x33   :  { %312 = vmatprep.subr.mxu0 %v90_v18  ;;  %360 = vmatprep.subr.mxu1 %v465_v0  ;;  %v98_v45 = vld [vmem:[#allocation3] sm:$0xff]  ;;  %v190_v46 = vld [vmem:[#allocation7 + $0x20] sm:$0xff]  ;;  %v189_v47 = vld [vmem:[#allocation7 + $0x18] sm:$0xff] }
  0x34   :  { %313 = vmatpush3.msra.mxu0 %v74_v19  ;;  %361 = vmatpush3.msra.mxu1 %v196_v29  ;;  %v188_v48 = vld [vmem:[#allocation7 + $0x10] sm:$0xff]  ;;  %v187_v49 = vld [vmem:[#allocation7 + $0x8] sm:$0xff]  ;;  %v186_v50 = vld [vmem:[#allocation7] sm:$0xff] }
  0x35   :  { %314 = vmatprep.subr.mxu0 %v89_v21  ;;  %362 = vmatprep.subr.mxu1 %v465_v0  ;;  %v296_v53 = vld [vmem:[%s534_s2] ss:$0 sm:$0xff] }
  0x36   :  { %315 = vmatpush3.msra.mxu0 %v73_v22  ;;  %363 = vmatpush3.msra.mxu1 %v195_v32  ;;  %v297_v57 = vld [vmem:[%s536_s4] ss:$0 sm:$0xff] }
  0x37   :  { %316 = vmatprep.subr.mxu0 %v88_v24  ;;  %364 = vmatprep.subr.mxu1 %v465_v0 }
  0x38   :  { %317 = vmatpush3.msra.mxu0 %v72_v25  ;;  %365 = vmatpush3.msra.mxu1 %v194_v35 }
  0x39   :  { %318 = vmatprep.subr.mxu0 %v87_v27  ;;  %366 = vmatprep.subr.mxu1 %v465_v0 }
  0x3a   :  { %319 = vmatpush3.msra.mxu0 %v71_v28  ;;  %367 = vmatpush3.msra.mxu1 %v193_v38 }
  0x3b   :  { %320 = vmatprep.subr.mxu0 %v86_v30  ;;  %368 = vmatprep.subr.mxu1 %v465_v0 }
  0x3c   :  { %321 = vmatpush3.msra.mxu0 %v70_v31  ;;  %369 = vmatpush3.msra.mxu1 %v192_v41 }
  0x3d   :  { %322 = vmatprep.subr.mxu0 %v85_v33  ;;  %370 = vmatprep.subr.mxu1 %v465_v0 }
  0x3e   :  { %323 = vmatpush3.msra.mxu0 %v69_v34  ;;  %371 = vmatpush3.msra.mxu1 %v191_v44 }
  0x3f   :  { %324 = vmatprep.subr.mxu0 %v84_v36  ;;  %372 = vmatprep.subr.mxu1 %v465_v0 }
  0x40   :  { %325 = vmatpush3.msra.mxu0 %v68_v37  ;;  %373 = vmatpush3.msra.mxu1 %v190_v46 }
  0x41   :  { %326 = vmatprep.subr.mxu0 %v83_v39  ;;  %374 = vmatprep.subr.mxu1 %v465_v0 }
  0x42   :  { %327 = vmatpush3.msra.mxu0 %v67_v40  ;;  %375 = vmatpush3.msra.mxu1 %v189_v47 }
  0x43   :  { %328 = vmatprep.subr.mxu0 %v82_v42  ;;  %376 = vmatprep.subr.mxu1 %v465_v0 }
  0x44   :  { %329 = vmatpush3.msra.mxu0 %v66_v43  ;;  %377 = vmatpush3.msra.mxu1 %v188_v48 }
  0x45   :  { %166 = vmatmul.mubr.f32.vlgmr.msra.gmra.mxu0 %v98_v45  ;;  %378 = vmatprep.subr.mxu1 %v465_v0 }
  0x46   :  { %379 = vmatpush3.msra.mxu1 %v187_v49 }
  0x47   :  { %380 = vmatprep.subr.mxu1 %v465_v0 }
  0x48   :  { %381 = vmatpush3.msra.mxu1 %v186_v50 }
 0x105   :  { %v330_v51 = vpop.f32.mrf.mxu0 }
 0x107   :  { %v331_v52 = vpop.f32.mrf.mxu0 }
 0x108   :  { %v332_v54 = vadd.f32 %v331_v52, %v330_v51 }
 0x10a   :  { %v184_v55 = vadd.f32 %v332_v54, %v296_v53 }
 0x10c   :  { %v185_v56 = vmax.f32 %v184_v55, 0.0 }
 0x10e   :  { %383 = vmatmul.mubr.f32.vlgmr.msra.gmra.mxu1 %v185_v56 }
 0x1ce   :  { %v275_v58 = vpop.f32.mrf.mxu1 }
 0x1cf   :  { %v276_v59 = vadd.f32 %v297_v57, %v275_v58 }
 0x1d0   :  { %v384_v60 = vpop.f32.mrf.mxu1 }
 0x1d1   :  { %279 = vmax.xlane.f32.xlu0 %v276_v59 }
 0x25a   :  { %v280_v61 = vpop.xlane.xlu0 %279 }
 0x25b   :  { %v281_v62 = vsub.f32 %v276_v59, %v280_v61 }
 0x25d   :  { %v282_v63 = vmul.f32 1.442695, %v281_v62 }
 0x25f   :  { %392 = vpow2.f32 %v282_v63 }
 0x26c   :  { %v393_v0 = vpop.eup %392 }
 0x26d   :  { %284 = vadd.xlane.f32.xlu0 %v393_v0 }
 0x2f6   :  { %v285_v1 = vpop.xlane.xlu0 %284 }
 0x2f7   :  { %394 = vlog2.f32 %v285_v1 }
 0x304   :  { %v395_v2 = vpop.eup %394 }
 0x305   :  { %v287_v3 = vmul.f32 0.6931472, %v395_v2 }
 0x307   :  { %v288_v4 = vsub.f32 %v281_v62, %v287_v3 }
 0x309   :  { %289 = vst [vmem:[%s537_s5] sm:$0xff] %v288_v4 }
 0x30a   :  { %294 = vsyncpa [#allocation4], 1 }
 0x30b   :  { %295 = vsyncpa [#allocation6], 1 }

</bundles_post_ra>
